<compile_context>
chip_gen: v7x
topology: tpu7x:2x2x1
jax: 0.10.0
libtpu: 0.0.40
codegen_flags: <defaults>
</compile_context>

<pallas_src>
import jax
import jax.numpy as jnp
from jax.experimental import pallas as pl
from jax.experimental.pallas import tpu as pltpu


def _round_up(x, m):
    return ((x + m - 1) // m) * m


def _pad_to(arr, shape):
    pads = [(0, t - s) for s, t in zip(arr.shape, shape)]
    return jnp.pad(arr, pads)


def _controller_mlp_kernel(x_ref, w1_ref, c1_ref, w2_ref, c2_ref, o_ref):
    # In-kernel bf16 cast of the activation tile (saves a wrapper HBM pass over x).
    x = x_ref[...].astype(jnp.bfloat16)

    # Layer 1: Linear (bias + eval-mode BatchNorm folded into weights/shift) + ReLU.
    h = jnp.dot(x, w1_ref[...], preferred_element_type=jnp.float32)
    h = jnp.maximum(h + c1_ref[...], 0.0)

    # Layer 2: Linear + folded shift + ReLU. Padded hidden lanes are exactly zero
    # (zero weight cols, zero shift, ReLU(0)=0) and the matching w2 rows are zero,
    # so they contribute nothing.
    h = jnp.dot(h.astype(jnp.bfloat16), w2_ref[...],
                preferred_element_type=jnp.float32)
    h = jnp.maximum(h + c2_ref[...], 0.0)

    # Softmax over the (unpadded) feature axis. Division via EUP approx reciprocal.
    m = jnp.max(h, axis=1, keepdims=True)
    e = jnp.exp(h - m)
    denom = jnp.sum(e, axis=1, keepdims=True)
    o_ref[...] = (e * pl.reciprocal(denom, approx=True)).astype(o_ref.dtype)


def prepare_params(params):
    """One-time: pad hidden dim to 128 lanes and cast weights to bf16 (MXU operands).

    params: folded per-layer params (BN scale already folded into weights):
      w1: [D0, D1], c1: [D1], w2: [D1, D2], c2: [D2]   (float32)
    """
    w1, c1 = params["w1"], params["c1"]
    w2, c2 = params["w2"], params["c2"]
    D0, D1 = w1.shape
    D2 = w2.shape[1]
    D1p = _round_up(D1, 128)  # lane-dense hidden; do NOT pad further (not MXU-bound)
    return {
        "w1": _pad_to(w1, (D0, D1p)).astype(jnp.bfloat16),
        "c1": _pad_to(c1.reshape(1, D1), (1, D1p)).astype(jnp.float32),
        "w2": _pad_to(w2, (D1p, D2)).astype(jnp.bfloat16),
        "c2": c2.reshape(1, D2).astype(jnp.float32),
    }


def controller_mlp_forward(x, prepared, *, bm_cap=1024):
    """x: [B, input_dim] float32. Returns softmax probabilities [B, D2] float32."""
    B, D0 = x.shape
    w1, c1 = prepared["w1"], prepared["c1"]
    w2, c2 = prepared["w2"], prepared["c2"]
    D1p = w1.shape[1]
    D2 = w2.shape[1]

    # Largest batch tile (multiple of 16 sublanes), fewest grid steps. The kernel is
    # per-step-overhead / HBM-pass bound, not VMEM bound (a bm=1024 step uses only a
    # few MiB double-buffered, well under every generation's scoped VMEM default).
    bm = max(16, min(_round_up(B, 16), bm_cap))
    Bp = _round_up(B, bm)
    xin = x if Bp == B else jnp.pad(x, ((0, Bp - B), (0, 0)))

    out = pl.pallas_call(
        _controller_mlp_kernel,
        out_shape=jax.ShapeDtypeStruct((Bp, D2), jnp.float32),
        grid_spec=pl.GridSpec(
            grid=(Bp // bm,),
            in_specs=[
                pl.BlockSpec((bm, D0), lambda i: (i, 0)),    # x tile (streamed)
                pl.BlockSpec((D0, D1p), lambda i: (0, 0)),   # W1 (resident)
                pl.BlockSpec((1, D1p), lambda i: (0, 0)),    # shift1
                pl.BlockSpec((D1p, D2), lambda i: (0, 0)),   # W2 (resident)
                pl.BlockSpec((1, D2), lambda i: (0, 0)),     # shift2
            ],
            out_specs=pl.BlockSpec((bm, D2), lambda i: (i, 0)),
        ),
        compiler_params=pltpu.CompilerParams(
            dimension_semantics=("parallel",)),
    )(xin, w1, c1, w2, c2)
    return out if Bp == B else out[:B]


def make_params(key, input_dim, embed_dims, eps=1e-5):
    """Deterministic PyTorch-like init, with Linear bias + eval-mode BatchNorm folded:

    y = ((x @ W + b) - mean) * gamma / sqrt(var + eps) + beta
      = x @ (W * a) + (b * a + beta - mean * a),   a = gamma / sqrt(var + eps)
    """
    params = {}
    dims = [input_dim] + list(embed_dims)
    keys = jax.random.split(key, 6 * len(embed_dims))
    kit = iter(keys)
    for li, (din, dout) in enumerate(zip(dims[:-1], dims[1:]), start=1):
        bound = 1.0 / jnp.sqrt(jnp.float32(din))
        w = jax.random.uniform(next(kit), (din, dout), jnp.float32, -bound, bound)
        b = jax.random.uniform(next(kit), (dout,), jnp.float32, -bound, bound)
        gamma = 1.0 + 0.1 * jax.random.normal(next(kit), (dout,), jnp.float32)
        beta = 0.1 * jax.random.normal(next(kit), (dout,), jnp.float32)
        run_mean = 0.1 * jax.random.normal(next(kit), (dout,), jnp.float32)
        run_var = jnp.abs(1.0 + 0.1 * jax.random.normal(next(kit), (dout,), jnp.float32))
        a = gamma / jnp.sqrt(run_var + eps)
        params[f"w{li}"] = (w * a[None, :]).astype(jnp.float32)
        params[f"c{li}"] = (b * a + (beta - run_mean * a)).astype(jnp.float32)
    return params


def reference_forward_bf16(x, params):
    """Pure-JAX reference mirroring the kernel's compute (bf16 matmuls, f32 acc)."""
    h = jnp.dot(x.astype(jnp.bfloat16), params["w1"].astype(jnp.bfloat16),
                preferred_element_type=jnp.float32)
    h = jnp.maximum(h + params["c1"][None, :], 0.0)
    h = jnp.dot(h.astype(jnp.bfloat16), params["w2"].astype(jnp.bfloat16),
                preferred_element_type=jnp.float32)
    h = jnp.maximum(h + params["c2"][None, :], 0.0)
    return jax.nn.softmax(h, axis=1)


def reference_forward_f32(x, params):
    """Full-precision reference (module semantics in eval mode)."""
    h = jnp.maximum(x @ params["w1"] + params["c1"][None, :], 0.0)
    h = jnp.maximum(h @ params["w2"] + params["c2"][None, :], 0.0)
    return jax.nn.softmax(h, axis=1)


if __name__ == "__main__":
    # Small shapes consistent with the module: input_dim=16, embed_dims=[32, 16], B=256.
    B, input_dim = 256, 16
    embed_dims = [32, 16]

    key = jax.random.PRNGKey(0)
    kx, kp = jax.random.split(key)
    x = jax.random.normal(kx, (B, input_dim), jnp.float32)
    params = make_params(kp, input_dim, embed_dims)
    prepared = prepare_params(params)          # one-time pad/cast, not per call

    out = jax.block_until_ready(controller_mlp_forward(x, prepared))
    assert out.shape == (B, embed_dims[-1])

    ref_bf16 = reference_forward_bf16(x, params)
    ref_f32 = reference_forward_f32(x, params)

    # Tight check vs. a reference mirroring the kernel's bf16/f32-acc compute;
    # loose check vs. the full-f32 module semantics (bf16 operands + approx recip).
    assert jnp.allclose(out, ref_bf16, atol=3e-3, rtol=3e-3), "mismatch vs bf16 reference"
    assert jnp.allclose(out, ref_f32, atol=3e-2, rtol=3e-2), "mismatch vs f32 reference"
    assert jnp.allclose(jnp.sum(out, axis=1), 1.0, atol=5e-3), "softmax rows must sum to 1"

    print("KERNEL_OK")
</pallas_src>

<mosaic_0001>
module attributes {stable_mosaic.version = 11 : i64} {
  func.func @_controller_mlp_kernel(%arg0: i32, %arg1: memref<256x16xf32, #tpu.memory_space<vmem>>, %arg2: memref<16x128xbf16, #tpu.memory_space<vmem>>, %arg3: memref<1x128xf32, #tpu.memory_space<vmem>>, %arg4: memref<128x16xbf16, #tpu.memory_space<vmem>>, %arg5: memref<1x16xf32, #tpu.memory_space<vmem>>, %arg6: memref<256x16xf32, #tpu.memory_space<vmem>>) attributes {dimension_semantics = [#tpu.dimension_semantics<parallel>], iteration_bounds = array<i64: 1>, scalar_prefetch = 0 : i64, scratch_operands = 0 : i64, tpu.core_type = #tpu.core_type<tc>, window_params = [{transform_indices = @transform_0, window_bounds = array<i64: 256, 16>}, {pipeline_mode = #tpu.pipeline_mode<synchronous>, transform_indices = @transform_1, window_bounds = array<i64: 16, 128>}, {pipeline_mode = #tpu.pipeline_mode<synchronous>, transform_indices = @transform_2, window_bounds = array<i64: 1, 128>}, {pipeline_mode = #tpu.pipeline_mode<synchronous>, transform_indices = @transform_3, window_bounds = array<i64: 128, 16>}, {pipeline_mode = #tpu.pipeline_mode<synchronous>, transform_indices = @transform_4, window_bounds = array<i64: 1, 16>}, {transform_indices = @transform_5, window_bounds = array<i64: 256, 16>}]} {
    %c0 = arith.constant 0 : index
    %c0_0 = arith.constant 0 : index
    %0 = vector.load %arg1[%c0, %c0_0] : memref<256x16xf32, #tpu.memory_space<vmem>>, vector<256x16xf32>
    %1 = arith.truncf %0 : vector<256x16xf32> to vector<256x16xbf16>
    %c0_1 = arith.constant 0 : index
    %c0_2 = arith.constant 0 : index
    %2 = vector.load %arg2[%c0_1, %c0_2] : memref<16x128xbf16, #tpu.memory_space<vmem>>, vector<16x128xbf16>
    %cst = arith.constant dense<0.000000e+00> : vector<256x128xf32>
    %3 = tpu.matmul %1, %2, %cst {dimension_numbers = #tpu.dot_dimension_numbers<[1], [0], [0], [1], [0, 0, 1, 1], [], []>} : vector<256x16xbf16>, vector<16x128xbf16>, vector<256x128xf32> -> vector<256x128xf32>
    %c0_3 = arith.constant 0 : index
    %c0_4 = arith.constant 0 : index
    %4 = vector.load %arg3[%c0_3, %c0_4] : memref<1x128xf32, #tpu.memory_space<vmem>>, vector<1x128xf32>
    %5 = vector.broadcast %4 : vector<1x128xf32> to vector<256x128xf32>
    %6 = arith.addf %3, %5 : vector<256x128xf32>
    %cst_5 = arith.constant 0.000000e+00 : f32
    %7 = vector.broadcast %cst_5 : f32 to vector<256x128xf32>
    %8 = arith.maximumf %6, %7 : vector<256x128xf32>
    %9 = arith.truncf %8 : vector<256x128xf32> to vector<256x128xbf16>
    %c0_6 = arith.constant 0 : index
    %c0_7 = arith.constant 0 : index
    %10 = vector.load %arg4[%c0_6, %c0_7] : memref<128x16xbf16, #tpu.memory_space<vmem>>, vector<128x16xbf16>
    %cst_8 = arith.constant dense<0.000000e+00> : vector<256x16xf32>
    %11 = tpu.matmul %9, %10, %cst_8 {dimension_numbers = #tpu.dot_dimension_numbers<[1], [0], [0], [1], [0, 0, 1, 1], [], []>} : vector<256x128xbf16>, vector<128x16xbf16>, vector<256x16xf32> -> vector<256x16xf32>
    %c0_9 = arith.constant 0 : index
    %c0_10 = arith.constant 0 : index
    %12 = vector.load %arg5[%c0_9, %c0_10] : memref<1x16xf32, #tpu.memory_space<vmem>>, vector<1x16xf32>
    %13 = vector.broadcast %12 : vector<1x16xf32> to vector<256x16xf32>
    %14 = arith.addf %11, %13 : vector<256x16xf32>
    %cst_11 = arith.constant 0.000000e+00 : f32
    %15 = vector.broadcast %cst_11 : f32 to vector<256x16xf32>
    %16 = arith.maximumf %14, %15 : vector<256x16xf32>
    %cst_12 = arith.constant dense<0xFF800000> : vector<256xf32>
    %17 = vector.multi_reduction <maximumf>, %16, %cst_12 [1] : vector<256x16xf32> to vector<256xf32>
    %18 = vector.shape_cast %17 : vector<256xf32> to vector<256x1xf32>
    %19 = vector.broadcast %18 : vector<256x1xf32> to vector<256x16xf32>
    %20 = arith.subf %16, %19 : vector<256x16xf32>
    %21 = math.exp %20 : vector<256x16xf32>
    %cst_13 = arith.constant dense<0.000000e+00> : vector<256xf32>
    %22 = vector.multi_reduction <add>, %21, %cst_13 [1] : vector<256x16xf32> to vector<256xf32>
    %23 = vector.shape_cast %22 : vector<256xf32> to vector<256x1xf32>
    %24 = tpu.reciprocal %23 {approx = true} : vector<256x1xf32> -> vector<256x1xf32>
    %25 = vector.broadcast %24 : vector<256x1xf32> to vector<256x16xf32>
    %26 = arith.mulf %21, %25 : vector<256x16xf32>
    %c0_14 = arith.constant 0 : index
    %c0_15 = arith.constant 0 : index
    %27 = vector.load %arg6[%c0_14, %c0_15] : memref<256x16xf32, #tpu.memory_space<vmem>>, vector<256x16xf32>
    tpu.vector_store %arg6[%c0_14, %c0_15], %26 {strides = array<i32>} : memref<256x16xf32, #tpu.memory_space<vmem>>, vector<256x16xf32>,
    return
  }
  func.func @transform_0(%arg0: i32) -> (i32, i32) {
    %c0_i32 = arith.constant 0 : i32
    %c0_i32_0 = arith.constant 0 : i32
    return %arg0, %c0_i32 : i32, i32
  }
  func.func @transform_1(%arg0: i32) -> (i32, i32) {
    %c0_i32 = arith.constant 0 : i32
    %c0_i32_0 = arith.constant 0 : i32
    %c0_i32_1 = arith.constant 0 : i32
    return %c0_i32, %c0_i32_0 : i32, i32
  }
  func.func @transform_2(%arg0: i32) -> (i32, i32) {
    %c0_i32 = arith.constant 0 : i32
    %c0_i32_0 = arith.constant 0 : i32
    %c0_i32_1 = arith.constant 0 : i32
    return %c0_i32, %c0_i32_0 : i32, i32
  }
  func.func @transform_3(%arg0: i32) -> (i32, i32) {
    %c0_i32 = arith.constant 0 : i32
    %c0_i32_0 = arith.constant 0 : i32
    %c0_i32_1 = arith.constant 0 : i32
    return %c0_i32, %c0_i32_0 : i32, i32
  }
  func.func @transform_4(%arg0: i32) -> (i32, i32) {
    %c0_i32 = arith.constant 0 : i32
    %c0_i32_0 = arith.constant 0 : i32
    %c0_i32_1 = arith.constant 0 : i32
    return %c0_i32, %c0_i32_0 : i32, i32
  }
  func.func @transform_5(%arg0: i32) -> (i32, i32) {
    %c0_i32 = arith.constant 0 : i32
    %c0_i32_0 = arith.constant 0 : i32
    return %arg0, %c0_i32 : i32, i32
  }
}

</mosaic_0001>

<bundles_post_ra>
// kernel: tpu_custom_call.1
= control target key start
LH: loop header
LB: loop body
LE: loop exit
PB: predicated region body
PF: predicated region fallthrough
CT: control target
= control target key end

     0   :  { %vm84_vm0 = vcmask 130048   ;;  %s2084_s1 = inlined_call_operand.vmem [shape: bf16[16,128], index: 1, kind: input, shape index: {}]   ;;  %s2085_s0 = inlined_call_operand.vmem [shape: f32[256,16], index: 0, kind: input, shape index: {}]   ;;  %s2086_s3 = inlined_call_operand.vmem [shape: bf16[128,16], index: 3, kind: input, shape index: {}]   ;;  %s2087_s2 = inlined_call_operand.vmem [shape: f32[1,128], index: 2, kind: input, shape index: {}]   ;;  %s2088_s4 = inlined_call_operand.vmem [shape: f32[1,16], index: 4, kind: input, shape index: {}]   ;;  %s2089_s5 = inlined_call_operand.vmem [shape: f32[256,16], index: 5, kind: output, shape index: {}]  }
   0x1   :  { %v1160_v0 = vld [vmem:[%s2084_s1] sm:$0xff]   ;;  %v22_v2 = vld [vmem:[%s2085_s0 + $0x8] sm:$0xff]  ;;  %v23_v3 = vld [vmem:[%s2085_s0 + $0x10] sm:$0xff] }
   0x2   :  { %v21_v1 = vld [vmem:[%s2085_s0] sm:$0xff]  ;;  %1062 = vmatprep.subr.bf16.mxu0 %v1160_v0  ;;  %v24_v5 = vld [vmem:[%s2085_s0 + $0x18] sm:$0xff]  ;;  %v26_v7 = vld [vmem:[%s2085_s0 + $0x28] sm:$0xff] }
   0x3   :  { %v53_v4 = vpack.c.bf16 %v22_v2, %v21_v1  ;;  %v25_v6 = vld [vmem:[%s2085_s0 + $0x20] sm:$0xff]  ;;  %1063 = vmatpush3.bf16.msra.mxu0 %v1160_v0  ;;  %v54_v8 = vpack.c.bf16 %v24_v5, %v23_v3  ;;  %v27_v10 = vld [vmem:[%s2085_s0 + $0x30] sm:$0xff]  ;;  %v28_v11 = vld [vmem:[%s2085_s0 + $0x38] sm:$0xff] }
   0x4   :  { %v55_v9 = vpack.c.bf16 %v26_v7, %v25_v6  ;;  %v29_v12 = vld [vmem:[%s2085_s0 + $0x40] sm:$0xff]  ;;  %v30_v13 = vld [vmem:[%s2085_s0 + $0x48] sm:$0xff]  ;;  %v56_v14 = vpack.c.bf16 %v28_v11, %v27_v10  ;;  %v31_v17 = vld [vmem:[%s2085_s0 + $0x50] sm:$0xff] }
   0x5   :  { %1064 = vmatprep.mubr.msk.bf16.mxu0 %vm84_vm0, %v53_v4  ;;  %v57_v15 = vpack.c.bf16 %v30_v13, %v29_v12  ;;  %v1161_v16 = vld [vmem:[%s2086_s3] sm:$0xff]   ;;  %v32_v18 = vld [vmem:[%s2085_s0 + $0x58] sm:$0xff]  ;;  %v1162_v19 = vld [vmem:[%s2086_s3 + $0x8] sm:$0xff]  }
   0x6   :  { %1065 = vmatmul.mubr.msk.bf16.vlgmr.msra.gmra.mrb[0].mxu0 %vm84_vm0, %v54_v8  ;;  %v33_v20 = vld [vmem:[%s2085_s0 + $0x60] sm:$0xff]  ;;  %1096 = vmatprep.subr.bf16.mxu0 %v1161_v16  ;;  %v34_v21 = vld [vmem:[%s2085_s0 + $0x68] sm:$0xff]  ;;  %v1163_v22 = vld [vmem:[%s2086_s3 + $0x10] sm:$0xff]   ;;  %v58_v23 = vpack.c.bf16 %v32_v18, %v31_v17 }
   0x7   :  { %1068 = vmatprep.mubr.msk.bf16.mxu0 %vm84_vm0, %v55_v9  ;;  %1097 = vmatpush3.bf16.msra.mxu0 %v1161_v16  ;;  %v59_v24 = vpack.c.bf16 %v34_v21, %v33_v20  ;;  %v1164_v25 = vld [vmem:[%s2086_s3 + $0x18] sm:$0xff]   ;;  %v35_v26 = vld [vmem:[%s2085_s0 + $0x70] sm:$0xff]  ;;  %v37_v28 = vld [vmem:[%s2085_s0 + $0x80] sm:$0xff] }
   0x8   :  { %1098 = vmatprep.subr.bf16.mxu0 %v1162_v19  ;;  %1144 = vmatprep.subr.bf16.mxu1 %v1161_v16  ;;  %v36_v27 = vld [vmem:[%s2085_s0 + $0x78] sm:$0xff]  ;;  %v38_v29 = vld [vmem:[%s2085_s0 + $0x88] sm:$0xff]  ;;  %v1165_v30 = vld [vmem:[%s2086_s3 + $0x20] sm:$0xff]  }
   0x9   :  { %1152 = vmatpush3.bf16.msra.mxu1 %v1161_v16  ;;  %v60_v31 = vpack.c.bf16 %v36_v27, %v35_v26  ;;  %v61_v32 = vpack.c.bf16 %v38_v29, %v37_v28  ;;  %v1166_v33 = vld [vmem:[%s2086_s3 + $0x28] sm:$0xff]   ;;  %v39_v34 = vld [vmem:[%s2085_s0 + $0x90] sm:$0xff]  ;;  %v40_v35 = vld [vmem:[%s2085_s0 + $0x98] sm:$0xff] }
   0xa   :  { %1145 = vmatprep.subr.bf16.mxu1 %v1162_v19  ;;  %v41_v36 = vld [vmem:[%s2085_s0 + $0xa0] sm:$0xff]  ;;  %v42_v37 = vld [vmem:[%s2085_s0 + $0xa8] sm:$0xff]  ;;  %v1167_v38 = vld [vmem:[%s2086_s3 + $0x30] sm:$0xff]   ;;  %v62_v39 = vpack.c.bf16 %v40_v35, %v39_v34 }
   0xb   :  { %1099 = vmatpush3.bf16.msra.mxu0 %v1162_v19  ;;  %v63_v40 = vpack.c.bf16 %v42_v37, %v41_v36  ;;  %v43_v41 = vld [vmem:[%s2085_s0 + $0xb0] sm:$0xff]  ;;  %v44_v42 = vld [vmem:[%s2085_s0 + $0xb8] sm:$0xff]  ;;  %v45_v43 = vld [vmem:[%s2085_s0 + $0xc0] sm:$0xff] }
   0xc   :  { %1100 = vmatprep.subr.bf16.mxu0 %v1163_v22  ;;  %v46_v44 = vld [vmem:[%s2085_s0 + $0xc8] sm:$0xff]  ;;  %v64_v45 = vpack.c.bf16 %v44_v42, %v43_v41  ;;  %v47_v47 = vld [vmem:[%s2085_s0 + $0xd0] sm:$0xff]  ;;  %v48_v48 = vld [vmem:[%s2085_s0 + $0xd8] sm:$0xff] }
   0xd   :  { %1153 = vmatpush3.bf16.msra.mxu1 %v1162_v19  ;;  %v65_v46 = vpack.c.bf16 %v46_v44, %v45_v43  ;;  %v49_v49 = vld [vmem:[%s2085_s0 + $0xe0] sm:$0xff]  ;;  %v50_v50 = vld [vmem:[%s2085_s0 + $0xe8] sm:$0xff]  ;;  %v66_v51 = vpack.c.bf16 %v48_v48, %v47_v47  ;;  %v51_v53 = vld [vmem:[%s2085_s0 + $0xf0] sm:$0xff] }
   0xe   :  { %1069 = vmatmul.mubr.msk.bf16.gmra.mrb[4].mxu0 %vm84_vm0, %v56_v14  ;;  %1146 = vmatprep.subr.bf16.mxu1 %v1163_v22  ;;  %v67_v52 = vpack.c.bf16 %v50_v50, %v49_v49  ;;  %v52_v54 = vld [vmem:[%s2085_s0 + $0xf8] sm:$0xff]  ;;  %v1469_v57 = vld [vmem:[%s2087_s2] ss:$0 sm:$0xff] }
   0xf   :  { %1072 = vmatprep.mubr.msk.bf16.mxu0 %vm84_vm0, %v57_v15  ;;  %1101 = vmatpush3.bf16.msra.mxu0 %v1163_v22  ;;  %v68_v55 = vpack.c.bf16 %v52_v54, %v51_v53  ;;  %v1168_v56 = vld [vmem:[%s2086_s3 + $0x38] sm:$0xff]  }
  0x10   :  { %1102 = vmatprep.subr.bf16.mxu0 %v1164_v25 }
  0x11   :  { %1154 = vmatpush3.bf16.msra.mxu1 %v1163_v22 }
  0x12   :  { %1147 = vmatprep.subr.bf16.mxu1 %v1164_v25 }
  0x13   :  { %1103 = vmatpush3.bf16.msra.mxu0 %v1164_v25 }
  0x14   :  { %1104 = vmatprep.subr.bf16.mxu0 %v1165_v30 }
  0x15   :  { %1155 = vmatpush3.bf16.msra.mxu1 %v1164_v25 }
  0x16   :  { %1073 = vmatmul.mubr.msk.bf16.gmra.mrb[8].mxu0 %vm84_vm0, %v58_v23  ;;  %1148 = vmatprep.subr.bf16.mxu1 %v1165_v30 }
  0x17   :  { %1076 = vmatprep.mubr.msk.bf16.mxu0 %vm84_vm0, %v59_v24  ;;  %1105 = vmatpush3.bf16.msra.mxu0 %v1165_v30 }
  0x18   :  { %1106 = vmatprep.subr.bf16.mxu0 %v1166_v33 }
  0x19   :  { %1156 = vmatpush3.bf16.msra.mxu1 %v1165_v30 }
  0x1a   :  { %1149 = vmatprep.subr.bf16.mxu1 %v1166_v33 }
  0x1b   :  { %1107 = vmatpush3.bf16.msra.mxu0 %v1166_v33 }
  0x1c   :  { %1108 = vmatprep.subr.bf16.mxu0 %v1167_v38 }
  0x1d   :  { %1157 = vmatpush3.bf16.msra.mxu1 %v1166_v33 }
  0x1e   :  { %1077 = vmatmul.mubr.msk.bf16.gmra.mrb[12].mxu0 %vm84_vm0, %v60_v31  ;;  %1150 = vmatprep.subr.bf16.mxu1 %v1167_v38 }
  0x1f   :  { %1080 = vmatprep.mubr.msk.bf16.mxu0 %vm84_vm0, %v61_v32  ;;  %1109 = vmatpush3.bf16.msra.mxu0 %v1167_v38 }
  0x20   :  { %1110 = vmatprep.subr.bf16.mxu0 %v1168_v56 }
  0x21   :  { %1158 = vmatpush3.bf16.msra.mxu1 %v1167_v38 }
  0x22   :  { %1151 = vmatprep.subr.bf16.mxu1 %v1168_v56 }
  0x23   :  { %1111 = vmatpush3.bf16.msra.mxu0 %v1168_v56 }
  0x25   :  { %1159 = vmatpush3.bf16.msra.mxu1 %v1168_v56 }
  0x26   :  { %1081 = vmatmul.mubr.msk.bf16.gmra.mrb[16].mxu0 %vm84_vm0, %v62_v39 }
  0x27   :  { %1084 = vmatprep.mubr.msk.bf16.mxu0 %vm84_vm0, %v63_v40 }
  0x2e   :  { %1085 = vmatmul.mubr.msk.bf16.gmra.mrb[20].mxu0 %vm84_vm0, %v64_v45 }
  0x2f   :  { %1088 = vmatprep.mubr.msk.bf16.mxu0 %vm84_vm0, %v65_v46 }
  0x36   :  { %1089 = vmatmul.mubr.msk.bf16.gmra.mrb[24].mxu0 %vm84_vm0, %v66_v51 }
  0x37   :  { %1092 = vmatprep.mubr.msk.bf16.mxu0 %vm84_vm0, %v67_v52 }
  0x3e   :  { %1093 = vmatmul.mubr.msk.bf16.gmra.mrb[28].mxu0 %vm84_vm0, %v68_v55 }
  0xd9   :  { %v1066_v58 = vpop.f32.mrb[0].mxu0 }
  0xda   :  { %v176_v59 = vadd.f32 %v1066_v58, %v1469_v57  ;;  %v167_v60 = vpop.f32.mrb[1].mxu0 }
  0xdb   :  { %v168_v61 = vadd.f32 %v1469_v57, %v167_v60  ;;  %v1067_v62 = vpop.f32.mrb[2].mxu0 }
  0xdc   :  { %v179_v63 = vadd.f32 %v1067_v62, %v1469_v57  ;;  %v170_v0 = vpop.f32.mrb[3].mxu0  ;;  %v296_v2 = vmax.f32 %v176_v59, 0.0 }
  0xdd   :  { %v171_v1 = vadd.f32 %v1469_v57, %v170_v0  ;;  %v294_v4 = vmax.f32 %v168_v61, 0.0 }
  0xde   :  { %v297_v3 = vmax.f32 %v179_v63, 0.0 }
  0xdf   :  { %v295_v5 = vmax.f32 %v171_v1, 0.0 }
  0xe0   :  { %v327_v6 = vpack.c.bf16 %v297_v3, %v296_v2 }
  0xe1   :  { %v326_v7 = vpack.c.bf16 %v295_v5, %v294_v4  ;;  %v1070_v8 = vpop.f32.mrb[4].mxu0 }
  0xe2   :  { %v192_v9 = vadd.f32 %v1070_v8, %v1469_v57  ;;  %v183_v10 = vpop.f32.mrb[5].mxu0 }
  0xe3   :  { %v184_v11 = vadd.f32 %v1469_v57, %v183_v10  ;;  %v1071_v12 = vpop.f32.mrb[6].mxu0  ;;  %1112 = vmatprep.mubr.bf16.mxu0 %v326_v7 }
  0xe4   :  { %v300_v13 = vmax.f32 %v192_v9, 0.0  ;;  %v195_v14 = vadd.f32 %v1071_v12, %v1469_v57  ;;  %v186_v15 = vpop.f32.mrb[7].mxu0  ;;  %1113 = vmatmul.mubr.bf16.vlgmr.msra.gmra.mrb[32].mxu0 %v327_v6 }
  0xe5   :  { %v187_v16 = vadd.f32 %v1469_v57, %v186_v15  ;;  %v298_v18 = vmax.f32 %v184_v11, 0.0 }
  0xe6   :  { %v301_v17 = vmax.f32 %v195_v14, 0.0 }
  0xe7   :  { %v299_v19 = vmax.f32 %v187_v16, 0.0 }
  0xe8   :  { %v329_v20 = vpack.c.bf16 %v301_v17, %v300_v13 }
  0xe9   :  { %v1074_v21 = vpop.f32.mrb[8].mxu0  ;;  %v328_v22 = vpack.c.bf16 %v299_v19, %v298_v18 }
  0xea   :  { %v208_v23 = vadd.f32 %v1074_v21, %v1469_v57  ;;  %v199_v24 = vpop.f32.mrb[9].mxu0 }
  0xeb   :  { %v200_v25 = vadd.f32 %v1469_v57, %v199_v24  ;;  %v1075_v26 = vpop.f32.mrb[10].mxu0  ;;  %1116 = vmatprep.mubr.bf16.mxu1 %v328_v22 }
  0xec   :  { %v304_v27 = vmax.f32 %v208_v23, 0.0  ;;  %v211_v28 = vadd.f32 %v1075_v26, %v1469_v57  ;;  %v202_v29 = vpop.f32.mrb[11].mxu0  ;;  %1117 = vmatmul.mubr.bf16.vlgmr.msra.gmra.mrb[0].mxu1 %v329_v20 }
  0xed   :  { %v203_v30 = vadd.f32 %v1469_v57, %v202_v29  ;;  %v302_v32 = vmax.f32 %v200_v25, 0.0 }
  0xee   :  { %v305_v31 = vmax.f32 %v211_v28, 0.0 }
  0xef   :  { %v303_v33 = vmax.f32 %v203_v30, 0.0 }
  0xf0   :  { %v331_v34 = vpack.c.bf16 %v305_v31, %v304_v27 }
  0xf1   :  { %v330_v35 = vpack.c.bf16 %v303_v33, %v302_v32  ;;  %v1078_v36 = vpop.f32.mrb[12].mxu0 }
  0xf2   :  { %v224_v37 = vadd.f32 %v1078_v36, %v1469_v57  ;;  %v215_v38 = vpop.f32.mrb[13].mxu0 }
  0xf3   :  { %v216_v39 = vadd.f32 %v1469_v57, %v215_v38  ;;  %v1079_v40 = vpop.f32.mrb[14].mxu0  ;;  %1120 = vmatprep.mubr.bf16.mxu1 %v330_v35 }
  0xf4   :  { %v308_v41 = vmax.f32 %v224_v37, 0.0  ;;  %v227_v42 = vadd.f32 %v1079_v40, %v1469_v57  ;;  %v218_v43 = vpop.f32.mrb[15].mxu0  ;;  %1121 = vmatmul.mubr.bf16.gmra.mrb[4].mxu1 %v331_v34 }
  0xf5   :  { %v219_v44 = vadd.f32 %v1469_v57, %v218_v43  ;;  %v306_v46 = vmax.f32 %v216_v39, 0.0  ;;  %v1506_v43 = vld [vmem:[%s2088_s4] ss:$0 sm:$0xff] }
  0xf6   :  { %v309_v45 = vmax.f32 %v227_v42, 0.0 }
  0xf7   :  { %v307_v47 = vmax.f32 %v219_v44, 0.0 }
  0xf8   :  { %v333_v48 = vpack.c.bf16 %v309_v45, %v308_v41 }
  0xf9   :  { %v332_v49 = vpack.c.bf16 %v307_v47, %v306_v46  ;;  %v1082_v50 = vpop.f32.mrb[16].mxu0 }
  0xfa   :  { %v240_v51 = vadd.f32 %v1082_v50, %v1469_v57  ;;  %v231_v52 = vpop.f32.mrb[17].mxu0 }
  0xfb   :  { %v232_v53 = vadd.f32 %v1469_v57, %v231_v52  ;;  %v1083_v54 = vpop.f32.mrb[18].mxu0  ;;  %1124 = vmatprep.mubr.bf16.mxu1 %v332_v49 }
  0xfc   :  { %v312_v55 = vmax.f32 %v240_v51, 0.0  ;;  %v243_v56 = vadd.f32 %v1083_v54, %v1469_v57  ;;  %v234_v58 = vpop.f32.mrb[19].mxu0  ;;  %1125 = vmatmul.mubr.bf16.gmra.mrb[8].mxu1 %v333_v48 }
  0xfd   :  { %v235_v59 = vadd.f32 %v1469_v57, %v234_v58  ;;  %v310_v61 = vmax.f32 %v232_v53, 0.0 }
  0xfe   :  { %v313_v60 = vmax.f32 %v243_v56, 0.0 }
  0xff   :  { %v311_v62 = vmax.f32 %v235_v59, 0.0 }
 0x100   :  { %v335_v63 = vpack.c.bf16 %v313_v60, %v312_v55 }
 0x101   :  { %v334_v0 = vpack.c.bf16 %v311_v62, %v310_v61  ;;  %v1086_v1 = vpop.f32.mrb[20].mxu0 }
 0x102   :  { %v256_v2 = vadd.f32 %v1086_v1, %v1469_v57  ;;  %v247_v3 = vpop.f32.mrb[21].mxu0 }
 0x103   :  { %v248_v4 = vadd.f32 %v1469_v57, %v247_v3  ;;  %v1087_v5 = vpop.f32.mrb[22].mxu0  ;;  %1128 = vmatprep.mubr.bf16.mxu1 %v334_v0 }
 0x104   :  { %v316_v6 = vmax.f32 %v256_v2, 0.0  ;;  %v259_v7 = vadd.f32 %v1087_v5, %v1469_v57  ;;  %v250_v8 = vpop.f32.mrb[23].mxu0  ;;  %1129 = vmatmul.mubr.bf16.gmra.mrb[12].mxu1 %v335_v63 }
 0x105   :  { %v251_v9 = vadd.f32 %v1469_v57, %v250_v8  ;;  %v314_v11 = vmax.f32 %v248_v4, 0.0 }
 0x106   :  { %v317_v10 = vmax.f32 %v259_v7, 0.0 }
 0x107   :  { %v315_v12 = vmax.f32 %v251_v9, 0.0 }
 0x108   :  { %v337_v13 = vpack.c.bf16 %v317_v10, %v316_v6 }
 0x109   :  { %v336_v14 = vpack.c.bf16 %v315_v12, %v314_v11  ;;  %v1090_v15 = vpop.f32.mrb[24].mxu0 }
 0x10a   :  { %v272_v16 = vadd.f32 %v1090_v15, %v1469_v57  ;;  %v263_v17 = vpop.f32.mrb[25].mxu0 }
 0x10b   :  { %v264_v18 = vadd.f32 %v1469_v57, %v263_v17  ;;  %v1091_v19 = vpop.f32.mrb[26].mxu0  ;;  %1132 = vmatprep.mubr.bf16.mxu1 %v336_v14 }
 0x10c   :  { %v320_v20 = vmax.f32 %v272_v16, 0.0  ;;  %v275_v21 = vadd.f32 %v1091_v19, %v1469_v57  ;;  %v266_v22 = vpop.f32.mrb[27].mxu0  ;;  %1133 = vmatmul.mubr.bf16.gmra.mrb[16].mxu1 %v337_v13 }
 0x10d   :  { %v267_v23 = vadd.f32 %v1469_v57, %v266_v22  ;;  %v318_v25 = vmax.f32 %v264_v18, 0.0 }
 0x10e   :  { %v321_v24 = vmax.f32 %v275_v21, 0.0 }
 0x10f   :  { %v319_v26 = vmax.f32 %v267_v23, 0.0 }
 0x110   :  { %v339_v27 = vpack.c.bf16 %v321_v24, %v320_v20 }
 0x111   :  { %v338_v28 = vpack.c.bf16 %v319_v26, %v318_v25  ;;  %v1094_v29 = vpop.f32.mrb[28].mxu0 }
 0x112   :  { %v288_v30 = vadd.f32 %v1094_v29, %v1469_v57  ;;  %v279_v31 = vpop.f32.mrb[29].mxu0 }
 0x113   :  { %v280_v32 = vadd.f32 %v1469_v57, %v279_v31  ;;  %v1095_v33 = vpop.f32.mrb[30].mxu0  ;;  %1136 = vmatprep.mubr.bf16.mxu1 %v338_v28 }
 0x114   :  { %v324_v34 = vmax.f32 %v288_v30, 0.0  ;;  %v291_v35 = vadd.f32 %v1095_v33, %v1469_v57  ;;  %v282_v36 = vpop.f32.mrb[31].mxu0  ;;  %1137 = vmatmul.mubr.bf16.gmra.mrb[20].mxu1 %v339_v27 }
 0x115   :  { %v283_v37 = vadd.f32 %v1469_v57, %v282_v36  ;;  %v322_v39 = vmax.f32 %v280_v32, 0.0 }
 0x116   :  { %v325_v38 = vmax.f32 %v291_v35, 0.0 }
 0x117   :  { %v323_v40 = vmax.f32 %v283_v37, 0.0 }
 0x118   :  { %v341_v41 = vpack.c.bf16 %v325_v38, %v324_v34 }
 0x119   :  { %v340_v42 = vpack.c.bf16 %v323_v40, %v322_v39 }
 0x11b   :  { %1140 = vmatprep.mubr.bf16.mxu1 %v340_v42 }
 0x11c   :  { %1141 = vmatmul.mubr.bf16.gmra.mrb[24].mxu1 %v341_v41 }
 0x1b7   :  { %v1114_v44 = vpop.f32.mrb[32].mxu0 }
 0x1b8   :  { %v1509_v45 = vadd.f32 %v1114_v44, %v1506_v43  ;;  %v447_v46 = vpop.f32.mrb[33].mxu0 }
 0x1b9   :  { %v1512_v47 = vadd.f32 %v1506_v43, %v447_v46  ;;  %v1115_v57 = vpop.f32.mrb[34].mxu0 }
 0x1ba   :  { %v576_v48 = vmax.f32 %v1509_v45, 0.0  ;;  %v1516_v49 = vadd.f32 %v1115_v57, %v1506_v43  ;;  %v450_v50 = vpop.f32.mrb[35].mxu0 }
 0x1bb   :  { %v574_v51 = vmax.f32 %v1512_v47, 0.0  ;;  %v1520_v52 = vadd.f32 %v1506_v43, %v450_v50 }
 0x1bc   :  { %v577_v53 = vmax.f32 %v1516_v49, 0.0  ;;  %v612_v54 = vsel %vm84_vm0, %v576_v48, -inf }
 0x1bd   :  { %v575_v55 = vmax.f32 %v1520_v52, 0.0  ;;  %613 = vmax.xlane.f32.xlu1 %v612_v54  ;;  %v606_v56 = vsel %vm84_vm0, %v574_v51, -inf }
 0x1be   :  { %607 = vmax.xlane.f32.xlu0 %v606_v56  ;;  %v615_v61 = vsel %vm84_vm0, %v577_v53, -inf }
 0x1bf   :  { %v1118_v58 = vpop.f32.mrb[0].mxu1  ;;  %v609_v0 = vsel %vm84_vm0, %v575_v55, -inf }
 0x1c0   :  { %v1531_v59 = vadd.f32 %v1118_v58, %v1506_v43  ;;  %v463_v60 = vpop.f32.mrb[1].mxu1 }
 0x1c1   :  { %v1537_v62 = vadd.f32 %v1506_v43, %v463_v60  ;;  %v1119_v63 = vpop.f32.mrb[2].mxu1  ;;  %616 = vmax.xlane.f32.xlu1 %v615_v61 }
 0x1c2   :  { %v580_v1 = vmax.f32 %v1531_v59, 0.0  ;;  %v1544_v2 = vadd.f32 %v1119_v63, %v1506_v43  ;;  %v466_v3 = vpop.f32.mrb[3].mxu1  ;;  %610 = vmax.xlane.f32.xlu0 %v609_v0 }
 0x1c3   :  { %v1547_v4 = vadd.f32 %v1506_v43, %v466_v3  ;;  %v578_v7 = vmax.f32 %v1537_v62, 0.0 }
 0x1c4   :  { %v581_v5 = vmax.f32 %v1544_v2, 0.0  ;;  %v624_v6 = vsel %vm84_vm0, %v580_v1, -inf }
 0x1c5   :  { %v579_v8 = vmax.f32 %v1547_v4, 0.0  ;;  %v618_v15 = vsel %vm84_vm0, %v578_v7, -inf }
 0x1c6   :  { %625 = vmax.xlane.f32.xlu0 %v624_v6  ;;  %v627_v9 = vsel %vm84_vm0, %v581_v5, -inf }
 0x1c7   :  { %v1122_v10 = vpop.f32.mrb[4].mxu1  ;;  %628 = vmax.xlane.f32.xlu1 %v627_v9  ;;  %v621_v19 = vsel %vm84_vm0, %v579_v8, -inf }
 0x1c8   :  { %v1559_v11 = vadd.f32 %v1122_v10, %v1506_v43  ;;  %v479_v12 = vpop.f32.mrb[5].mxu1 }
 0x1c9   :  { %v1562_v13 = vadd.f32 %v1506_v43, %v479_v12  ;;  %v1123_v14 = vpop.f32.mrb[6].mxu1 }
 0x1ca   :  { %v584_v16 = vmax.f32 %v1559_v11, 0.0  ;;  %v1569_v17 = vadd.f32 %v1123_v14, %v1506_v43  ;;  %v482_v18 = vpop.f32.mrb[7].mxu1  ;;  %619 = vmax.xlane.f32.xlu0 %v618_v15 }
 0x1cb   :  { %v1575_v20 = vadd.f32 %v1506_v43, %v482_v18  ;;  %622 = vmax.xlane.f32.xlu1 %v621_v19  ;;  %v582_v23 = vmax.f32 %v1562_v13, 0.0 }
 0x1cc   :  { %v585_v21 = vmax.f32 %v1569_v17, 0.0  ;;  %v636_v22 = vsel %vm84_vm0, %v584_v16, -inf }
 0x1cd   :  { %v583_v24 = vmax.f32 %v1575_v20, 0.0  ;;  %v630_v31 = vsel %vm84_vm0, %v582_v23, -inf }
 0x1ce   :  { %637 = vmax.xlane.f32.xlu0 %v636_v22  ;;  %v639_v25 = vsel %vm84_vm0, %v585_v21, -inf }
 0x1cf   :  { %v1126_v26 = vpop.f32.mrb[8].mxu1  ;;  %640 = vmax.xlane.f32.xlu1 %v639_v25  ;;  %v633_v35 = vsel %vm84_vm0, %v583_v24, -inf }
 0x1d0   :  { %v1587_v27 = vadd.f32 %v1126_v26, %v1506_v43  ;;  %v495_v28 = vpop.f32.mrb[9].mxu1 }
 0x1d1   :  { %v1590_v29 = vadd.f32 %v1506_v43, %v495_v28  ;;  %v1127_v30 = vpop.f32.mrb[10].mxu1 }
 0x1d2   :  { %v588_v32 = vmax.f32 %v1587_v27, 0.0  ;;  %v1597_v33 = vadd.f32 %v1127_v30, %v1506_v43  ;;  %v498_v34 = vpop.f32.mrb[11].mxu1  ;;  %631 = vmax.xlane.f32.xlu0 %v630_v31 }
 0x1d3   :  { %v1603_v36 = vadd.f32 %v1506_v43, %v498_v34  ;;  %634 = vmax.xlane.f32.xlu1 %v633_v35  ;;  %v586_v39 = vmax.f32 %v1590_v29, 0.0 }
 0x1d4   :  { %v589_v37 = vmax.f32 %v1597_v33, 0.0  ;;  %v648_v38 = vsel %vm84_vm0, %v588_v32, -inf }
 0x1d5   :  { %v587_v40 = vmax.f32 %v1603_v36, 0.0  ;;  %v642_v54 = vsel %vm84_vm0, %v586_v39, -inf }
 0x1d6   :  { %649 = vmax.xlane.f32.xlu0 %v648_v38  ;;  %v651_v41 = vsel %vm84_vm0, %v589_v37, -inf }
 0x1d7   :  { %v1130_v42 = vpop.f32.mrb[12].mxu1  ;;  %652 = vmax.xlane.f32.xlu1 %v651_v41  ;;  %v645_v61 = vsel %vm84_vm0, %v587_v40, -inf }
 0x1d8   :  { %v1615_v44 = vadd.f32 %v1130_v42, %v1506_v43  ;;  %v511_v46 = vpop.f32.mrb[13].mxu1 }
 0x1d9   :  { %v1618_v57 = vadd.f32 %v1506_v43, %v511_v46  ;;  %v1131_v50 = vpop.f32.mrb[14].mxu1 }
 0x1da   :  { %v592_v56 = vmax.f32 %v1615_v44, 0.0  ;;  %v1625_v58 = vadd.f32 %v1131_v50, %v1506_v43  ;;  %v514_v60 = vpop.f32.mrb[15].mxu1  ;;  %643 = vmax.xlane.f32.xlu0 %v642_v54 }
 0x1db   :  { %v1631_v63 = vadd.f32 %v1506_v43, %v514_v60  ;;  %646 = vmax.xlane.f32.xlu1 %v645_v61  ;;  %v590_v6 = vmax.f32 %v1618_v57, 0.0 }
 0x1dc   :  { %v593_v0 = vmax.f32 %v1625_v58, 0.0  ;;  %v660_v3 = vsel %vm84_vm0, %v592_v56, -inf }
 0x1dd   :  { %v591_v9 = vmax.f32 %v1631_v63, 0.0  ;;  %v654_v22 = vsel %vm84_vm0, %v590_v6, -inf }
 0x1de   :  { %661 = vmax.xlane.f32.xlu0 %v660_v3  ;;  %v663_v10 = vsel %vm84_vm0, %v593_v0, -inf }
 0x1df   :  { %v1134_v12 = vpop.f32.mrb[16].mxu1  ;;  %664 = vmax.xlane.f32.xlu1 %v663_v10  ;;  %v657_v30 = vsel %vm84_vm0, %v591_v9, -inf }
 0x1e0   :  { %v1643_v14 = vadd.f32 %v1134_v12, %v1506_v43  ;;  %v527_v15 = vpop.f32.mrb[17].mxu1 }
 0x1e1   :  { %v1646_v18 = vadd.f32 %v1506_v43, %v527_v15  ;;  %v1135_v19 = vpop.f32.mrb[18].mxu1 }
 0x1e2   :  { %v2101_v25 = vmax.f32 %v1643_v14, 0.0  ;;  %v1653_v26 = vadd.f32 %v1135_v19, %v1506_v43  ;;  %v530_v28 = vpop.f32.mrb[19].mxu1  ;;  %655 = vmax.xlane.f32.xlu0 %v654_v22 }
 0x1e3   :  { %v1659_v31 = vadd.f32 %v1506_v43, %v530_v28  ;;  %658 = vmax.xlane.f32.xlu1 %v657_v30  ;;  %v2093_v38 = vmax.f32 %v1646_v18, 0.0 }
 0x1e4   :  { %v2098_v34 = vmax.f32 %v1653_v26, 0.0  ;;  %v672_v35 = vsel %vm84_vm0, %v2101_v25, -inf }
 0x1e5   :  { %v2091_v41 = vmax.f32 %v1659_v31, 0.0  ;;  %v666_v3 = vsel %vm84_vm0, %v2093_v38, -inf }
 0x1e6   :  { %673 = vmax.xlane.f32.xlu0 %v672_v35  ;;  %v675_v42 = vsel %vm84_vm0, %v2098_v34, -inf }
 0x1e7   :  { %v1138_v46 = vpop.f32.mrb[20].mxu1  ;;  %676 = vmax.xlane.f32.xlu1 %v675_v42  ;;  %v669_v19 = vsel %vm84_vm0, %v2091_v41, -inf }
 0x1e8   :  { %v1671_v50 = vadd.f32 %v1138_v46, %v1506_v43  ;;  %v543_v54 = vpop.f32.mrb[21].mxu1 }
 0x1e9   :  { %v1674_v60 = vadd.f32 %v1506_v43, %v543_v54  ;;  %v1139_v61 = vpop.f32.mrb[22].mxu1 }
 0x1ea   :  { %v2090_v10 = vmax.f32 %v1671_v50, 0.0  ;;  %v1681_v12 = vadd.f32 %v1139_v61, %v1506_v43  ;;  %v546_v15 = vpop.f32.mrb[23].mxu1  ;;  %667 = vmax.xlane.f32.xlu0 %v666_v3 }
 0x1eb   :  { %v1687_v22 = vadd.f32 %v1506_v43, %v546_v15  ;;  %670 = vmax.xlane.f32.xlu1 %v669_v19  ;;  %v2096_v35 = vmax.f32 %v1674_v60, 0.0 }
 0x1ec   :  { %v2092_v28 = vmax.f32 %v1681_v12, 0.0  ;;  %v684_v30 = vsel %vm84_vm0, %v2090_v10, -inf }
 0x1ed   :  { %v2094_v42 = vmax.f32 %v1687_v22, 0.0  ;;  %v678_v10 = vsel %vm84_vm0, %v2096_v35, -inf }
 0x1ee   :  { %685 = vmax.xlane.f32.xlu0 %v684_v30  ;;  %v687_v46 = vsel %vm84_vm0, %v2092_v28, -inf }
 0x1ef   :  { %v1142_v54 = vpop.f32.mrb[24].mxu1  ;;  %688 = vmax.xlane.f32.xlu1 %v687_v46  ;;  %v681_v30 = vsel %vm84_vm0, %v2094_v42, -inf }
 0x1f0   :  { %v559_v61 = vpop.f32.mrb[25].mxu1  ;;  %v1699_v3 = vadd.f32 %v1142_v54, %v1506_v43 }
 0x1f1   :  { %v1702_v15 = vadd.f32 %v1506_v43, %v559_v61  ;;  %v1143_v19 = vpop.f32.mrb[26].mxu1 }
 0x1f2   :  { %v562_v41 = vpop.f32.mrb[27].mxu1  ;;  %679 = vmax.xlane.f32.xlu0 %v678_v10  ;;  %v1712_v28 = vadd.f32 %v1143_v19, %v1506_v43  ;;  %v2099_v61 = vmax.f32 %v1699_v3, 0.0 }
 0x1f3   :  { %v2095_v46 = vmax.f32 %v1702_v15, 0.0  ;;  %v1715_v54 = vadd.f32 %v1506_v43, %v562_v41  ;;  %682 = vmax.xlane.f32.xlu1 %v681_v30 }
 0x1f4   :  { %v2100_v42 = vmax.f32 %v1712_v28, 0.0  ;;  %v696_v43 = vsel %vm84_vm0, %v2099_v61, -inf }
 0x1f5   :  { %v2097_v38 = vmax.f32 %v1715_v54, 0.0  ;;  %v690_v10 = vsel %vm84_vm0, %v2095_v46, -inf }
 0x1f6   :  { %691 = vmax.xlane.f32.xlu0 %v690_v10  ;;  %v699_v41 = vsel %vm84_vm0, %v2100_v42, -inf }
 0x1f7   :  { %v693_v19 = vsel %vm84_vm0, %v2097_v38, -inf }
 0x1f8   :  { %694 = vmax.xlane.f32.xlu1 %v693_v19 }
 0x1fa   :  { %697 = vmax.xlane.f32.xlu0 %v696_v43 }
 0x1fc   :  { %700 = vmax.xlane.f32.xlu1 %v699_v41 }
 0x24a   :  { %v614_v30 = vpop.xlane.xlu1 %613 }
 0x24b   :  { %v704_v10 = vsub.f32 %v576_v48, %v614_v30  ;;  %v608_v46 = vpop.xlane.xlu0 %607 }
 0x24c   :  { %v702_v35 = vsub.f32 %v574_v51, %v608_v46 }
 0x24d   :  { %v738_v38 = vmul.f32 1.442695, %v704_v10 }
 0x24e   :  { %v734_v19 = vmul.f32 1.442695, %v702_v35  ;;  %v617_v34 = vpop.xlane.xlu1 %616 }
 0x24f   :  { %1169 = vpow2.f32 %v738_v38  ;;  %v705_v43 = vsub.f32 %v577_v53, %v617_v34  ;;  %v611_v61 = vpop.xlane.xlu0 %610 }
 0x250   :  { %v703_v42 = vsub.f32 %v575_v55, %v611_v61  ;;  %1171 = vpow2.f32 %v734_v19 }
 0x251   :  { %v740_v41 = vmul.f32 1.442695, %v705_v43 }
 0x252   :  { %v736_v25 = vmul.f32 1.442695, %v703_v42 }
 0x253   :  { %1173 = vpow2.f32 %v740_v41  ;;  %v626_v45 = vpop.xlane.xlu0 %625 }
 0x254   :  { %v708_v47 = vsub.f32 %v580_v1, %v626_v45  ;;  %v629_v48 = vpop.xlane.xlu1 %628  ;;  %1175 = vpow2.f32 %v736_v25 }
 0x255   :  { %v709_v51 = vsub.f32 %v581_v5, %v629_v48 }
 0x256   :  { %v746_v38 = vmul.f32 1.442695, %v708_v47 }
 0x257   :  { %v748_v49 = vmul.f32 1.442695, %v709_v51  ;;  %v620_v53 = vpop.xlane.xlu0 %619 }
 0x258   :  { %1177 = vpow2.f32 %v746_v38  ;;  %v706_v52 = vsub.f32 %v578_v7, %v620_v53  ;;  %v623_v55 = vpop.xlane.xlu1 %622 }
 0x259   :  { %v1746_v34 = vpop.eup %1169  ;;  %1179 = vpow2.f32 %v748_v49  ;;  %v707_v59 = vsub.f32 %v579_v8, %v623_v55 }
 0x25a   :  { %v742_v1 = vmul.f32 1.442695, %v706_v52  ;;  %v804_v25 = vsel %vm84_vm0, %v1746_v34, 0.0  ;;  %v1752_v2 = vpop.eup %1171 }
 0x25b   :  { %v744_v5 = vmul.f32 1.442695, %v707_v59  ;;  %805 = vadd.xlane.f32.xlu0 %v804_v25  ;;  %v638_v35 = vpop.xlane.xlu0 %637  ;;  %v798_v61 = vsel %vm84_vm0, %v1752_v2, 0.0 }
 0x25c   :  { %1181 = vpow2.f32 %v742_v1  ;;  %v712_v62 = vsub.f32 %v584_v16, %v638_v35  ;;  %v641_v7 = vpop.xlane.xlu1 %640 }
 0x25d   :  { %v1756_v42 = vpop.eup %1173  ;;  %1183 = vpow2.f32 %v744_v5  ;;  %v713_v4 = vsub.f32 %v585_v21, %v641_v7 }
 0x25e   :  { %v754_v8 = vmul.f32 1.442695, %v712_v62  ;;  %v807_v46 = vsel %vm84_vm0, %v1756_v42, 0.0  ;;  %v1764_v30 = vpop.eup %1175 }
 0x25f   :  { %v756_v10 = vmul.f32 1.442695, %v713_v4  ;;  %808 = vadd.xlane.f32.xlu1 %v807_v46  ;;  %799 = vadd.xlane.f32.xlu0 %v798_v61  ;;  %v632_v11 = vpop.xlane.xlu0 %631  ;;  %v801_v41 = vsel %vm84_vm0, %v1764_v30, 0.0 }
 0x260   :  { %1185 = vpow2.f32 %v754_v8  ;;  %v710_v16 = vsub.f32 %v582_v23, %v632_v11  ;;  %v635_v19 = vpop.xlane.xlu1 %634 }
 0x261   :  { %1187 = vpow2.f32 %v756_v10  ;;  %v711_v17 = vsub.f32 %v583_v24, %v635_v19 }
 0x262   :  { %v1770_v21 = vpop.eup %1177  ;;  %v750_v43 = vmul.f32 1.442695, %v710_v16 }
 0x263   :  { %v1774_v45 = vpop.eup %1179  ;;  %v752_v47 = vmul.f32 1.442695, %v711_v17  ;;  %802 = vadd.xlane.f32.xlu1 %v801_v41  ;;  %v650_v48 = vpop.xlane.xlu0 %649  ;;  %v816_v13 = vsel %vm84_vm0, %v1770_v21, 0.0 }
 0x264   :  { %1189 = vpow2.f32 %v750_v43  ;;  %v716_v23 = vsub.f32 %v588_v32, %v650_v48  ;;  %v653_v20 = vpop.xlane.xlu1 %652  ;;  %817 = vadd.xlane.f32.xlu0 %v816_v13  ;;  %v819_v49 = vsel %vm84_vm0, %v1774_v45, 0.0 }
 0x265   :  { %1191 = vpow2.f32 %v752_v47  ;;  %v717_v24 = vsub.f32 %v589_v37, %v653_v20 }
 0x266   :  { %v1782_v51 = vpop.eup %1181  ;;  %v762_v38 = vmul.f32 1.442695, %v716_v23 }
 0x267   :  { %v1786_v53 = vpop.eup %1183  ;;  %v764_v52 = vmul.f32 1.442695, %v717_v24  ;;  %820 = vadd.xlane.f32.xlu1 %v819_v49  ;;  %v644_v55 = vpop.xlane.xlu0 %643  ;;  %v810_v27 = vsel %vm84_vm0, %v1782_v51, 0.0 }
 0x268   :  { %1193 = vpow2.f32 %v762_v38  ;;  %v714_v32 = vsub.f32 %v586_v39, %v644_v55  ;;  %v647_v33 = vpop.xlane.xlu1 %646  ;;  %811 = vadd.xlane.f32.xlu0 %v810_v27  ;;  %v813_v25 = vsel %vm84_vm0, %v1786_v53, 0.0  ;;  %v2105_v27 = vmax.f32 %v1659_v31, 0.0 }
 0x269   :  { %1195 = vpow2.f32 %v764_v52  ;;  %v715_v37 = vsub.f32 %v587_v40, %v647_v33  ;;  %v2104_v52 = vmax.f32 %v1646_v18, 0.0 }
 0x26a   :  { %v1794_v59 = vpop.eup %1185  ;;  %v758_v1 = vmul.f32 1.442695, %v714_v32 }
 0x26b   :  { %v1798_v5 = vpop.eup %1187  ;;  %v760_v35 = vmul.f32 1.442695, %v715_v37  ;;  %814 = vadd.xlane.f32.xlu1 %v813_v25  ;;  %v662_v62 = vpop.xlane.xlu0 %661  ;;  %v828_v29 = vsel %vm84_vm0, %v1794_v59, 0.0 }
 0x26c   :  { %1197 = vpow2.f32 %v758_v1  ;;  %v720_v39 = vsub.f32 %v592_v56, %v662_v62  ;;  %v665_v36 = vpop.xlane.xlu1 %664  ;;  %829 = vadd.xlane.f32.xlu0 %v828_v29  ;;  %v831_v8 = vsel %vm84_vm0, %v1798_v5, 0.0  ;;  %v2106_v29 = vmax.f32 %v1671_v50, 0.0 }
 0x26d   :  { %1199 = vpow2.f32 %v760_v35  ;;  %v721_v40 = vsub.f32 %v593_v0, %v665_v36  ;;  %v2107_v36 = vmax.f32 %v1681_v12, 0.0 }
 0x26e   :  { %v1806_v7 = vpop.eup %1189  ;;  %v770_v4 = vmul.f32 1.442695, %v720_v39 }
 0x26f   :  { %v1810_v46 = vpop.eup %1191  ;;  %v772_v61 = vmul.f32 1.442695, %v721_v40  ;;  %832 = vadd.xlane.f32.xlu1 %v831_v8  ;;  %v656_v10 = vpop.xlane.xlu0 %655  ;;  %v822_v44 = vsel %vm84_vm0, %v1806_v7, 0.0 }
 0x270   :  { %1201 = vpow2.f32 %v770_v4  ;;  %v718_v56 = vsub.f32 %v590_v6, %v656_v10  ;;  %v659_v58 = vpop.xlane.xlu1 %658  ;;  %823 = vadd.xlane.f32.xlu0 %v822_v44  ;;  %v825_v19 = vsel %vm84_vm0, %v1810_v46, 0.0  ;;  %v2102_v6 = vmax.f32 %v1643_v14, 0.0 }
 0x271   :  { %1203 = vpow2.f32 %v772_v61  ;;  %v719_v0 = vsub.f32 %v591_v9, %v659_v58  ;;  %v2103_v9 = vmax.f32 %v1653_v26, 0.0  ;;  %v2108_v58 = vmax.f32 %v1674_v60, 0.0 }
 0x272   :  { %v1818_v11 = vpop.eup %1193  ;;  %v766_v16 = vmul.f32 1.442695, %v718_v56 }
 0x273   :  { %v1822_v17 = vpop.eup %1195  ;;  %v768_v43 = vmul.f32 1.442695, %v719_v0  ;;  %826 = vadd.xlane.f32.xlu1 %v825_v19  ;;  %v674_v41 = vpop.xlane.xlu0 %673  ;;  %v840_v57 = vsel %vm84_vm0, %v1818_v11, 0.0 }
 0x274   :  { %1205 = vpow2.f32 %v766_v16  ;;  %v724_v47 = vsub.f32 %v2102_v6, %v674_v41  ;;  %v677_v63 = vpop.xlane.xlu1 %676  ;;  %841 = vadd.xlane.f32.xlu0 %v840_v57  ;;  %v843_v20 = vsel %vm84_vm0, %v1822_v17, 0.0  ;;  %v2109_v16 = vmax.f32 %v1687_v22, 0.0 }
 0x275   :  { %1207 = vpow2.f32 %v768_v43  ;;  %v725_v48 = vsub.f32 %v2103_v9, %v677_v63  ;;  %v2110_v9 = vmax.f32 %v1702_v15, 0.0 }
 0x276   :  { %v1830_v13 = vpop.eup %1197  ;;  %v778_v23 = vmul.f32 1.442695, %v724_v47 }
 0x277   :  { %v1834_v24 = vpop.eup %1199  ;;  %v780_v38 = vmul.f32 1.442695, %v725_v48  ;;  %844 = vadd.xlane.f32.xlu1 %v843_v20  ;;  %v668_v49 = vpop.xlane.xlu0 %667  ;;  %v834_v14 = vsel %vm84_vm0, %v1830_v13, 0.0 }
 0x278   :  { %1209 = vpow2.f32 %v778_v23  ;;  %v722_v55 = vsub.f32 %v2104_v52, %v668_v49  ;;  %v671_v26 = vpop.xlane.xlu1 %670  ;;  %835 = vadd.xlane.f32.xlu0 %v834_v14  ;;  %v837_v1 = vsel %vm84_vm0, %v1834_v24, 0.0 }
 0x279   :  { %1211 = vpow2.f32 %v780_v38  ;;  %v723_v32 = vsub.f32 %v2105_v27, %v671_v26  ;;  %v2111_v38 = vmax.f32 %v1715_v54, 0.0  ;;  %v2112_v27 = vmax.f32 %v1699_v3, 0.0 }
 0x27a   :  { %v1842_v33 = vpop.eup %1201  ;;  %v774_v37 = vmul.f32 1.442695, %v722_v55 }
 0x27b   :  { %v1846_v25 = vpop.eup %1203  ;;  %v776_v35 = vmul.f32 1.442695, %v723_v32  ;;  %838 = vadd.xlane.f32.xlu1 %v837_v1  ;;  %v686_v62 = vpop.xlane.xlu0 %685  ;;  %v852_v18 = vsel %vm84_vm0, %v1842_v33, 0.0 }
 0x27c   :  { %1213 = vpow2.f32 %v774_v37  ;;  %v728_v39 = vsub.f32 %v2106_v29, %v686_v62  ;;  %v689_v31 = vpop.xlane.xlu1 %688  ;;  %853 = vadd.xlane.f32.xlu0 %v852_v18  ;;  %v855_v61 = vsel %vm84_vm0, %v1846_v25, 0.0 }
 0x27d   :  { %1215 = vpow2.f32 %v776_v35  ;;  %v729_v40 = vsub.f32 %v2107_v36, %v689_v31  ;;  %v2113_v35 = vmax.f32 %v1712_v28, 0.0 }
 0x27e   :  { %v1854_v4 = vpop.eup %1205  ;;  %v786_v8 = vmul.f32 1.442695, %v728_v39 }
 0x27f   :  { %v1858_v10 = vpop.eup %1207  ;;  %v788_v44 = vmul.f32 1.442695, %v729_v40  ;;  %856 = vadd.xlane.f32.xlu1 %v855_v61  ;;  %v680_v56 = vpop.xlane.xlu0 %679  ;;  %v846_v50 = vsel %vm84_vm0, %v1854_v4, 0.0 }
 0x280   :  { %1217 = vpow2.f32 %v786_v8  ;;  %v726_v0 = vsub.f32 %v2108_v58, %v680_v56  ;;  %v683_v12 = vpop.xlane.xlu1 %682  ;;  %847 = vadd.xlane.f32.xlu0 %v846_v50  ;;  %v849_v57 = vsel %vm84_vm0, %v1858_v10, 0.0 }
 0x281   :  { %1219 = vpow2.f32 %v788_v44  ;;  %v727_v19 = vsub.f32 %v2109_v16, %v683_v12 }
 0x282   :  { %v1866_v43 = vpop.eup %1209  ;;  %v782_v41 = vmul.f32 1.442695, %v726_v0 }
 0x283   :  { %v1870_v6 = vpop.eup %1211  ;;  %v784_v47 = vmul.f32 1.442695, %v727_v19  ;;  %850 = vadd.xlane.f32.xlu1 %v849_v57  ;;  %v692_v63 = vpop.xlane.xlu0 %691  ;;  %v864_v60 = vsel %vm84_vm0, %v1866_v43, 0.0 }
 0x284   :  { %1221 = vpow2.f32 %v782_v41  ;;  %v730_v48 = vsub.f32 %v2110_v9, %v692_v63  ;;  %865 = vadd.xlane.f32.xlu0 %v864_v60  ;;  %v867_v14 = vsel %vm84_vm0, %v1870_v6, 0.0 }
 0x285   :  { %1223 = vpow2.f32 %v784_v47  ;;  %v695_v22 = vpop.xlane.xlu1 %694 }
 0x286   :  { %v1876_v23 = vpop.eup %1213  ;;  %v790_v20 = vmul.f32 1.442695, %v730_v48  ;;  %v731_v49 = vsub.f32 %v2111_v38, %v695_v22 }
 0x287   :  { %v1882_v52 = vpop.eup %1215  ;;  %868 = vadd.xlane.f32.xlu1 %v867_v14  ;;  %v698_v55 = vpop.xlane.xlu0 %697  ;;  %v858_v15 = vsel %vm84_vm0, %v1876_v23, 0.0 }
 0x288   :  { %1225 = vpow2.f32 %v790_v20  ;;  %v792_v26 = vmul.f32 1.442695, %v731_v49  ;;  %v732_v32 = vsub.f32 %v2112_v27, %v698_v55  ;;  %859 = vadd.xlane.f32.xlu0 %v858_v15  ;;  %v861_v18 = vsel %vm84_vm0, %v1882_v52, 0.0 }
 0x289   :  { %v701_v37 = vpop.xlane.xlu1 %700 }
 0x28a   :  { %v1888_v1 = vpop.eup %1217  ;;  %1227 = vpow2.f32 %v792_v26  ;;  %v794_v54 = vmul.f32 1.442695, %v732_v32  ;;  %v733_v62 = vsub.f32 %v2113_v35, %v701_v37 }
 0x28b   :  { %v1894_v29 = vpop.eup %1219  ;;  %862 = vadd.xlane.f32.xlu1 %v861_v18  ;;  %v876_v39 = vsel %vm84_vm0, %v1888_v1, 0.0 }
 0x28c   :  { %1229 = vpow2.f32 %v794_v54  ;;  %v796_v3 = vmul.f32 1.442695, %v733_v62  ;;  %877 = vadd.xlane.f32.xlu0 %v876_v39  ;;  %v879_v36 = vsel %vm84_vm0, %v1894_v29, 0.0 }
 0x28e   :  { %v1898_v31 = vpop.eup %1221  ;;  %1231 = vpow2.f32 %v796_v3 }
 0x28f   :  { %v1902_v28 = vpop.eup %1223  ;;  %880 = vadd.xlane.f32.xlu1 %v879_v36  ;;  %v870_v40 = vsel %vm84_vm0, %v1898_v31, 0.0 }
 0x290   :  { %871 = vadd.xlane.f32.xlu0 %v870_v40  ;;  %v873_v61 = vsel %vm84_vm0, %v1902_v28, 0.0 }
 0x292   :  { %v1906_v8 = vpop.eup %1225 }
 0x293   :  { %874 = vadd.xlane.f32.xlu1 %v873_v61  ;;  %v882_v44 = vsel %vm84_vm0, %v1906_v8, 0.0 }
 0x294   :  { %v1912_v56 = vpop.eup %1227  ;;  %883 = vadd.xlane.f32.xlu0 %v882_v44 }
 0x295   :  { %v885_v50 = vsel %vm84_vm0, %v1912_v56, 0.0 }
 0x296   :  { %v1916_v58 = vpop.eup %1229 }
 0x297   :  { %886 = vadd.xlane.f32.xlu1 %v885_v50  ;;  %v888_v0 = vsel %vm84_vm0, %v1916_v58, 0.0 }
 0x298   :  { %v1920_v12 = vpop.eup %1231  ;;  %889 = vadd.xlane.f32.xlu0 %v888_v0 }
 0x299   :  { %v891_v16 = vsel %vm84_vm0, %v1920_v12, 0.0 }
 0x29b   :  { %892 = vadd.xlane.f32.xlu1 %v891_v16 }
 0x2e8   :  { %v806_v19 = vpop.xlane.xlu0 %805 }
 0x2e9   :  { %1233 = vrcp.f32 %v806_v19 }
 0x2ec   :  { %v809_v41 = vpop.xlane.xlu1 %808  ;;  %v800_v57 = vpop.xlane.xlu0 %799 }
 0x2ed   :  { %1235 = vrcp.f32 %v809_v41 }
 0x2ee   :  { %1237 = vrcp.f32 %v800_v57 }
 0x2f0   :  { %v803_v47 = vpop.xlane.xlu1 %802 }
 0x2f1   :  { %1239 = vrcp.f32 %v803_v47  ;;  %v818_v63 = vpop.xlane.xlu0 %817 }
 0x2f2   :  { %1241 = vrcp.f32 %v818_v63 }
 0x2f3   :  { %v1234_v60 = vpop.eup %1233 }
 0x2f4   :  { %v928_v9 = vmul.f32 %v1234_v60, %v1746_v34  ;;  %v821_v48 = vpop.xlane.xlu1 %820 }
 0x2f5   :  { %1243 = vrcp.f32 %v821_v48  ;;  %v812_v22 = vpop.xlane.xlu0 %811 }
 0x2f6   :  { %960 = vst.msk [vmem:[%s2089_s5 + $0x10] sm:$0xff] %vm84_vm0, %v928_v9  ;;  %1245 = vrcp.f32 %v812_v22 }
 0x2f7   :  { %v1236_v20 = vpop.eup %1235 }
 0x2f8   :  { %v1238_v38 = vpop.eup %1237  ;;  %v929_v49 = vmul.f32 %v1236_v20, %v1756_v42  ;;  %v815_v14 = vpop.xlane.xlu1 %814 }
 0x2f9   :  { %v926_v55 = vmul.f32 %v1238_v38, %v1752_v2  ;;  %1247 = vrcp.f32 %v815_v14  ;;  %v830_v15 = vpop.xlane.xlu0 %829 }
 0x2fa   :  { %961 = vst.msk [vmem:[%s2089_s5 + $0x18] sm:$0xff] %vm84_vm0, %v929_v49  ;;  %1249 = vrcp.f32 %v830_v15 }
 0x2fb   :  { %v1240_v34 = vpop.eup %1239  ;;  %958 = vst.msk [vmem:[%s2089_s5] sm:$0xff] %vm84_vm0, %v926_v55 }
 0x2fc   :  { %v1242_v26 = vpop.eup %1241  ;;  %v927_v42 = vmul.f32 %v1240_v34, %v1764_v30  ;;  %v833_v27 = vpop.xlane.xlu1 %832 }
 0x2fd   :  { %v932_v2 = vmul.f32 %v1242_v26, %v1770_v21  ;;  %1251 = vrcp.f32 %v833_v27  ;;  %v824_v32 = vpop.xlane.xlu0 %823 }
 0x2fe   :  { %959 = vst.msk [vmem:[%s2089_s5 + $0x8] sm:$0xff] %vm84_vm0, %v927_v42  ;;  %1253 = vrcp.f32 %v824_v32 }
 0x2ff   :  { %v1244_v37 = vpop.eup %1243  ;;  %964 = vst.msk [vmem:[%s2089_s5 + $0x30] sm:$0xff] %vm84_vm0, %v932_v2 }
 0x300   :  { %v1246_v54 = vpop.eup %1245  ;;  %v933_v30 = vmul.f32 %v1244_v37, %v1774_v45  ;;  %v827_v35 = vpop.xlane.xlu1 %826 }
 0x301   :  { %v930_v21 = vmul.f32 %v1246_v54, %v1782_v51  ;;  %1255 = vrcp.f32 %v827_v35  ;;  %v842_v62 = vpop.xlane.xlu0 %841 }
 0x302   :  { %965 = vst.msk [vmem:[%s2089_s5 + $0x38] sm:$0xff] %vm84_vm0, %v933_v30  ;;  %1257 = vrcp.f32 %v842_v62 }
 0x303   :  { %v1248_v18 = vpop.eup %1247  ;;  %962 = vst.msk [vmem:[%s2089_s5 + $0x20] sm:$0xff] %vm84_vm0, %v930_v21 }
 0x304   :  { %v1250_v39 = vpop.eup %1249  ;;  %v931_v45 = vmul.f32 %v1248_v18, %v1786_v53  ;;  %v845_v3 = vpop.xlane.xlu1 %844 }
 0x305   :  { %v936_v51 = vmul.f32 %v1250_v39, %v1794_v59  ;;  %1259 = vrcp.f32 %v845_v3  ;;  %v836_v36 = vpop.xlane.xlu0 %835 }
 0x306   :  { %963 = vst.msk [vmem:[%s2089_s5 + $0x28] sm:$0xff] %vm84_vm0, %v931_v45  ;;  %1261 = vrcp.f32 %v836_v36 }
 0x307   :  { %v1252_v40 = vpop.eup %1251  ;;  %968 = vst.msk [vmem:[%s2089_s5 + $0x50] sm:$0xff] %vm84_vm0, %v936_v51 }
 0x308   :  { %v1254_v61 = vpop.eup %1253  ;;  %v937_v53 = vmul.f32 %v1252_v40, %v1798_v5  ;;  %v839_v44 = vpop.xlane.xlu1 %838 }
 0x309   :  { %v934_v59 = vmul.f32 %v1254_v61, %v1806_v7  ;;  %1263 = vrcp.f32 %v839_v44  ;;  %v854_v50 = vpop.xlane.xlu0 %853 }
 0x30a   :  { %969 = vst.msk [vmem:[%s2089_s5 + $0x58] sm:$0xff] %vm84_vm0, %v937_v53  ;;  %1265 = vrcp.f32 %v854_v50 }
 0x30b   :  { %v1256_v0 = vpop.eup %1255  ;;  %966 = vst.msk [vmem:[%s2089_s5 + $0x40] sm:$0xff] %vm84_vm0, %v934_v59 }
 0x30c   :  { %v1258_v16 = vpop.eup %1257  ;;  %v935_v5 = vmul.f32 %v1256_v0, %v1810_v46  ;;  %v857_v19 = vpop.xlane.xlu1 %856 }
 0x30d   :  { %v940_v7 = vmul.f32 %v1258_v16, %v1818_v11  ;;  %1267 = vrcp.f32 %v857_v19  ;;  %v848_v41 = vpop.xlane.xlu0 %847 }
 0x30e   :  { %967 = vst.msk [vmem:[%s2089_s5 + $0x48] sm:$0xff] %vm84_vm0, %v935_v5  ;;  %1269 = vrcp.f32 %v848_v41 }
 0x30f   :  { %v1260_v57 = vpop.eup %1259  ;;  %972 = vst.msk [vmem:[%s2089_s5 + $0x70] sm:$0xff] %vm84_vm0, %v940_v7 }
 0x310   :  { %v1262_v47 = vpop.eup %1261  ;;  %v941_v46 = vmul.f32 %v1260_v57, %v1822_v17  ;;  %v851_v63 = vpop.xlane.xlu1 %850 }
 0x311   :  { %v938_v11 = vmul.f32 %v1262_v47, %v1830_v13  ;;  %1271 = vrcp.f32 %v851_v63  ;;  %v866_v60 = vpop.xlane.xlu0 %865 }
 0x312   :  { %973 = vst.msk [vmem:[%s2089_s5 + $0x78] sm:$0xff] %vm84_vm0, %v941_v46  ;;  %1273 = vrcp.f32 %v866_v60 }
 0x313   :  { %v1264_v9 = vpop.eup %1263  ;;  %970 = vst.msk [vmem:[%s2089_s5 + $0x60] sm:$0xff] %vm84_vm0, %v938_v11 }
 0x314   :  { %v1266_v48 = vpop.eup %1265  ;;  %v939_v17 = vmul.f32 %v1264_v9, %v1834_v24  ;;  %v869_v22 = vpop.xlane.xlu1 %868 }
 0x315   :  { %v944_v13 = vmul.f32 %v1266_v48, %v1842_v33  ;;  %1275 = vrcp.f32 %v869_v22  ;;  %v860_v20 = vpop.xlane.xlu0 %859 }
 0x316   :  { %971 = vst.msk [vmem:[%s2089_s5 + $0x68] sm:$0xff] %vm84_vm0, %v939_v17  ;;  %1277 = vrcp.f32 %v860_v20 }
 0x317   :  { %v1268_v38 = vpop.eup %1267  ;;  %976 = vst.msk [vmem:[%s2089_s5 + $0x90] sm:$0xff] %vm84_vm0, %v944_v13 }
 0x318   :  { %v1270_v49 = vpop.eup %1269  ;;  %v945_v24 = vmul.f32 %v1268_v38, %v1846_v25  ;;  %v863_v14 = vpop.xlane.xlu1 %862 }
 0x319   :  { %v942_v33 = vmul.f32 %v1270_v49, %v1854_v4  ;;  %1279 = vrcp.f32 %v863_v14  ;;  %v878_v55 = vpop.xlane.xlu0 %877 }
 0x31a   :  { %977 = vst.msk [vmem:[%s2089_s5 + $0x98] sm:$0xff] %vm84_vm0, %v945_v24  ;;  %1281 = vrcp.f32 %v878_v55 }
 0x31b   :  { %v1272_v15 = vpop.eup %1271  ;;  %974 = vst.msk [vmem:[%s2089_s5 + $0x80] sm:$0xff] %vm84_vm0, %v942_v33 }
 0x31c   :  { %v1274_v34 = vpop.eup %1273  ;;  %v943_v25 = vmul.f32 %v1272_v15, %v1858_v10  ;;  %v881_v26 = vpop.xlane.xlu1 %880 }
 0x31d   :  { %v948_v4 = vmul.f32 %v1274_v34, %v1866_v43  ;;  %1283 = vrcp.f32 %v881_v26  ;;  %v872_v42 = vpop.xlane.xlu0 %871 }
 0x31e   :  { %975 = vst.msk [vmem:[%s2089_s5 + $0x88] sm:$0xff] %vm84_vm0, %v943_v25  ;;  %1285 = vrcp.f32 %v872_v42 }
 0x31f   :  { %v1276_v27 = vpop.eup %1275  ;;  %980 = vst.msk [vmem:[%s2089_s5 + $0xb0] sm:$0xff] %vm84_vm0, %v948_v4 }
 0x320   :  { %v1278_v2 = vpop.eup %1277  ;;  %v949_v10 = vmul.f32 %v1276_v27, %v1870_v6  ;;  %v875_v32 = vpop.xlane.xlu1 %874 }
 0x321   :  { %v946_v43 = vmul.f32 %v1278_v2, %v1876_v23  ;;  %1287 = vrcp.f32 %v875_v32  ;;  %v884_v37 = vpop.xlane.xlu0 %883 }
 0x322   :  { %981 = vst.msk [vmem:[%s2089_s5 + $0xb8] sm:$0xff] %vm84_vm0, %v949_v10  ;;  %1289 = vrcp.f32 %v884_v37 }
 0x323   :  { %v1280_v54 = vpop.eup %1279  ;;  %978 = vst.msk [vmem:[%s2089_s5 + $0xa0] sm:$0xff] %vm84_vm0, %v946_v43 }
 0x324   :  { %v1282_v30 = vpop.eup %1281  ;;  %v947_v6 = vmul.f32 %v1280_v54, %v1882_v52  ;;  %v887_v35 = vpop.xlane.xlu1 %886 }
 0x325   :  { %v952_v23 = vmul.f32 %v1282_v30, %v1888_v1  ;;  %1291 = vrcp.f32 %v887_v35  ;;  %v890_v21 = vpop.xlane.xlu0 %889 }
 0x326   :  { %979 = vst.msk [vmem:[%s2089_s5 + $0xa8] sm:$0xff] %vm84_vm0, %v947_v6  ;;  %1293 = vrcp.f32 %v890_v21 }
 0x327   :  { %v1284_v62 = vpop.eup %1283  ;;  %984 = vst.msk [vmem:[%s2089_s5 + $0xd0] sm:$0xff] %vm84_vm0, %v952_v23 }
 0x328   :  { %v1286_v18 = vpop.eup %1285  ;;  %v953_v52 = vmul.f32 %v1284_v62, %v1894_v29  ;;  %v893_v39 = vpop.xlane.xlu1 %892 }
 0x329   :  { %v950_v1 = vmul.f32 %v1286_v18, %v1898_v31  ;;  %1295 = vrcp.f32 %v893_v39 }
 0x32a   :  { %985 = vst.msk [vmem:[%s2089_s5 + $0xd8] sm:$0xff] %vm84_vm0, %v953_v52 }
 0x32b   :  { %v1288_v45 = vpop.eup %1287  ;;  %982 = vst.msk [vmem:[%s2089_s5 + $0xc0] sm:$0xff] %vm84_vm0, %v950_v1 }
 0x32c   :  { %v1290_v3 = vpop.eup %1289  ;;  %v951_v51 = vmul.f32 %v1288_v45, %v1902_v28 }
 0x32d   :  { %v954_v29 = vmul.f32 %v1290_v3, %v1906_v8 }
 0x32e   :  { %983 = vst.msk [vmem:[%s2089_s5 + $0xc8] sm:$0xff] %vm84_vm0, %v951_v51 }
 0x32f   :  { %v1292_v31 = vpop.eup %1291  ;;  %986 = vst.msk [vmem:[%s2089_s5 + $0xe0] sm:$0xff] %vm84_vm0, %v954_v29 }
 0x330   :  { %v1294_v36 = vpop.eup %1293  ;;  %v955_v40 = vmul.f32 %v1292_v31, %v1912_v56 }
 0x331   :  { %v956_v61 = vmul.f32 %v1294_v36, %v1916_v58 }
 0x332   :  { %987 = vst.msk [vmem:[%s2089_s5 + $0xe8] sm:$0xff] %vm84_vm0, %v955_v40 }
 0x333   :  { %v1296_v28 = vpop.eup %1295  ;;  %988 = vst.msk [vmem:[%s2089_s5 + $0xf0] sm:$0xff] %vm84_vm0, %v956_v61 }
 0x334   :  { %v957_v8 = vmul.f32 %v1296_v28, %v1920_v12 }
 0x336   :  { %989 = vst.msk [vmem:[%s2089_s5 + $0xf8] sm:$0xff] %vm84_vm0, %v957_v8 }

</bundles_post_ra>
